<compile_context>
chip_gen: v7x
topology: tpu7x:2x2x1
jax: 0.10.0
libtpu: 0.0.40
codegen_flags: <defaults>
</compile_context>

<pallas_src>
import jax
import jax.numpy as jnp
from jax.experimental import pallas as pl
from jax.experimental.pallas import tpu as pltpu


def make_lstm_kernel(S, Bp, H):
    """Builds the kernel with static S (seq len), Bp (padded batch), H (hidden)."""

    def kernel(x_ref, wih_ref, whh_ref, b_ref, wfc_ref, bfc_ref,
               y_ref, xw_ref, hs_ref):
        # ---- Prologue: input projection for ALL timesteps in one matmul --------
        # x_ref: (S*Bp, I), wih_ref: (I, 4H), b_ref: (1, 4H) -> xw: (S*Bp, 4H)
        xw_ref[...] = (jnp.dot(x_ref[...], wih_ref[...],
                               preferred_element_type=jnp.float32)
                       + b_ref[...])

        # Recurrent weights loaded once: (H, 4H), lane-dense (4H = 128 here).
        whh = whh_ref[...]

        # ---- Recurrence: fully unrolled (S static, small); h/c in registers ----
        h = jnp.zeros((Bp, H), jnp.float32)
        c = jnp.zeros((Bp, H), jnp.float32)
        for t in range(S):
            off = t * Bp                                   # static, Bp-aligned
            # One fused recurrent matmul per step: (Bp,H) @ (H,4H) -> (Bp,4H).
            gates = xw_ref[pl.ds(off, Bp), :] + jnp.dot(
                h, whh, preferred_element_type=jnp.float32)
            # Whole-vreg activations (EUP is idle -> extra lanes are free),
            # then static lane slices per gate (PyTorch order: i, f, g, o).
            sig = jax.nn.sigmoid(gates)
            tnh = jnp.tanh(gates)
            i_g = sig[:, 0 * H:1 * H]
            f_g = sig[:, 1 * H:2 * H]
            g_g = tnh[:, 2 * H:3 * H]
            o_g = sig[:, 3 * H:4 * H]
            c = f_g * c + i_g * g_g
            h = o_g * jnp.tanh(c)
            hs_ref[pl.ds(off, Bp), :] = h

        # ---- Epilogue: batched output projection, one lane-dense store ---------
        # hs: (S*Bp, H), wfc: (H, O_pad), bfc: (1, O_pad) -> y: (S*Bp, O_pad)
        y_ref[...] = (jnp.dot(hs_ref[...], wfc_ref[...],
                              preferred_element_type=jnp.float32)
                      + bfc_ref[...]).astype(y_ref.dtype)

    return kernel


def lstm_rnn_forward(x, w_ih, w_hh, b_ih, b_hh, w_fc, b_fc):
    """x: (S, B, I).  Weights in PyTorch layout:
       w_ih (4H, I), w_hh (4H, H), b_ih (4H,), b_hh (4H,), w_fc (O, H), b_fc (O,)."""
    S, B, I = x.shape
    H = w_hh.shape[1]
    O = w_fc.shape[0]

    # Pad batch to the f32 sublane count and output to a lane-dense width.
    Bp = ((B + 7) // 8) * 8
    Op = ((O + 127) // 128) * 128

    # Host-side re-layouts so the kernel only does plain row-major matmuls and
    # aligned, unmasked stores.  Padded batch rows are zeros (independent of the
    # real rows); padded output lanes are zero weights/bias and sliced away.
    x_flat = jnp.pad(x, ((0, 0), (0, Bp - B), (0, 0))).reshape(S * Bp, I)
    wih_t = w_ih.T                                        # (I, 4H)
    whh_t = w_hh.T                                        # (H, 4H) fused gate weights
    b_all = (b_ih + b_hh).reshape(1, 4 * H)               # fused gate bias
    wfc_t = jnp.pad(w_fc.T, ((0, 0), (0, Op - O)))        # (H, O_pad)
    bfc = jnp.pad(b_fc, (0, Op - O)).reshape(1, Op)       # (1, O_pad)

    vmem = pltpu.MemorySpace.VMEM
    y_pad = pl.pallas_call(
        make_lstm_kernel(S, Bp, H),
        out_shape=jax.ShapeDtypeStruct((S * Bp, Op), jnp.float32),
        in_specs=[pl.BlockSpec(memory_space=vmem)] * 6,
        out_specs=pl.BlockSpec(memory_space=vmem),
        scratch_shapes=[
            pltpu.VMEM((S * Bp, 4 * H), jnp.float32),   # xw: lane-dense gates buffer
            pltpu.VMEM((S * Bp, H), jnp.float32),       # hs: h_t for every step
        ],
    )(x_flat, wih_t, whh_t, b_all, wfc_t, bfc)

    # Un-flatten and strip the batch / output padding outside the kernel.
    return y_pad.reshape(S, Bp, Op)[:, :B, :O]


def lstm_rnn_reference(x, w_ih, w_hh, b_ih, b_hh, w_fc, b_fc):
    """Pure-JAX reference replicating PyTorch nn.LSTM + nn.Linear semantics."""
    S, B, I = x.shape
    H = w_hh.shape[1]

    def step(carry, x_t):
        h, c = carry
        gates = x_t @ w_ih.T + h @ w_hh.T + b_ih + b_hh
        i_g = jax.nn.sigmoid(gates[:, 0 * H:1 * H])
        f_g = jax.nn.sigmoid(gates[:, 1 * H:2 * H])
        g_g = jnp.tanh(gates[:, 2 * H:3 * H])
        o_g = jax.nn.sigmoid(gates[:, 3 * H:4 * H])
        c_new = f_g * c + i_g * g_g
        h_new = o_g * jnp.tanh(c_new)
        return (h_new, c_new), h_new

    init = (jnp.zeros((B, H), jnp.float32), jnp.zeros((B, H), jnp.float32))
    _, hs = jax.lax.scan(step, init, x)            # (S, B, H)
    y = hs.reshape(S * B, H) @ w_fc.T + b_fc
    return y.reshape(S, B, -1)


if __name__ == "__main__":
    # Small shapes consistent with the module's forward (seq, batch, input_size).
    SEQ, BATCH = 8, 4
    INPUT_SIZE, HIDDEN_SIZE, OUTPUT_SIZE = 16, 32, 4

    key = jax.random.PRNGKey(0)
    ks = jax.random.split(key, 8)
    bound = 1.0 / (HIDDEN_SIZE ** 0.5)  # PyTorch default init range

    x = jax.random.normal(ks[0], (SEQ, BATCH, INPUT_SIZE), jnp.float32)
    w_ih = jax.random.uniform(ks[1], (4 * HIDDEN_SIZE, INPUT_SIZE), jnp.float32, -bound, bound)
    w_hh = jax.random.uniform(ks[2], (4 * HIDDEN_SIZE, HIDDEN_SIZE), jnp.float32, -bound, bound)
    b_ih = jax.random.uniform(ks[3], (4 * HIDDEN_SIZE,), jnp.float32, -bound, bound)
    b_hh = jax.random.uniform(ks[4], (4 * HIDDEN_SIZE,), jnp.float32, -bound, bound)
    w_fc = jax.random.uniform(ks[5], (OUTPUT_SIZE, HIDDEN_SIZE), jnp.float32, -bound, bound)
    b_fc = jax.random.uniform(ks[6], (OUTPUT_SIZE,), jnp.float32, -bound, bound)

    y = lstm_rnn_forward(x, w_ih, w_hh, b_ih, b_hh, w_fc, b_fc)
    y = jax.block_until_ready(y)

    y_ref = lstm_rnn_reference(x, w_ih, w_hh, b_ih, b_hh, w_fc, b_fc)
    assert y.shape == (SEQ, BATCH, OUTPUT_SIZE)
    assert jnp.allclose(y, y_ref, atol=1e-5, rtol=1e-5), "Pallas kernel mismatch vs reference"

    print("KERNEL_OK")
</pallas_src>

<mosaic_0001>
module attributes {stable_mosaic.version = 11 : i64} {
  func.func @kernel(%arg0: memref<64x16xf32, #tpu.memory_space<vmem>>, %arg1: memref<16x128xf32, #tpu.memory_space<vmem>>, %arg2: memref<32x128xf32, #tpu.memory_space<vmem>>, %arg3: memref<1x128xf32, #tpu.memory_space<vmem>>, %arg4: memref<32x128xf32, #tpu.memory_space<vmem>>, %arg5: memref<1x128xf32, #tpu.memory_space<vmem>>, %arg6: memref<64x128xf32, #tpu.memory_space<vmem>>, %arg7: memref<64x128xf32, #tpu.memory_space<vmem>>, %arg8: memref<64x32xf32, #tpu.memory_space<vmem>>) attributes {dimension_semantics = [], scalar_prefetch = 0 : i64, scratch_operands = 2 : i64, tpu.core_type = #tpu.core_type<tc>} {
    %c0 = arith.constant 0 : index
    %c0_0 = arith.constant 0 : index
    %0 = vector.load %arg0[%c0, %c0_0] : memref<64x16xf32, #tpu.memory_space<vmem>>, vector<64x16xf32>
    %c0_1 = arith.constant 0 : index
    %c0_2 = arith.constant 0 : index
    %1 = vector.load %arg1[%c0_1, %c0_2] : memref<16x128xf32, #tpu.memory_space<vmem>>, vector<16x128xf32>
    %cst = arith.constant dense<0.000000e+00> : vector<64x128xf32>
    %2 = tpu.matmul %0, %1, %cst {dimension_numbers = #tpu.dot_dimension_numbers<[1], [0], [0], [1], [0, 0, 1, 1], [], []>} : vector<64x16xf32>, vector<16x128xf32>, vector<64x128xf32> -> vector<64x128xf32>
    %c0_3 = arith.constant 0 : index
    %c0_4 = arith.constant 0 : index
    %3 = vector.load %arg3[%c0_3, %c0_4] : memref<1x128xf32, #tpu.memory_space<vmem>>, vector<1x128xf32>
    %4 = vector.broadcast %3 : vector<1x128xf32> to vector<64x128xf32>
    %5 = arith.addf %2, %4 : vector<64x128xf32>
    %c0_5 = arith.constant 0 : index
    %c0_6 = arith.constant 0 : index
    %6 = vector.load %arg7[%c0_5, %c0_6] : memref<64x128xf32, #tpu.memory_space<vmem>>, vector<64x128xf32>
    tpu.vector_store %arg7[%c0_5, %c0_6], %5 {strides = array<i32>} : memref<64x128xf32, #tpu.memory_space<vmem>>, vector<64x128xf32>,
    %c0_7 = arith.constant 0 : index
    %c0_8 = arith.constant 0 : index
    %7 = vector.load %arg2[%c0_7, %c0_8] : memref<32x128xf32, #tpu.memory_space<vmem>>, vector<32x128xf32>
    %cst_9 = arith.constant 0.000000e+00 : f32
    %8 = vector.broadcast %cst_9 : f32 to vector<8x32xf32>
    %cst_10 = arith.constant 0.000000e+00 : f32
    %9 = vector.broadcast %cst_10 : f32 to vector<8x32xf32>
    %c0_11 = arith.constant 0 : index
    %c0_12 = arith.constant 0 : index
    %10 = vector.load %arg7[%c0_11, %c0_12] : memref<64x128xf32, #tpu.memory_space<vmem>>, vector<8x128xf32>
    %cst_13 = arith.constant dense<0.000000e+00> : vector<8x128xf32>
    %11 = tpu.matmul %8, %7, %cst_13 {dimension_numbers = #tpu.dot_dimension_numbers<[1], [0], [0], [1], [0, 0, 1, 1], [], []>} : vector<8x32xf32>, vector<32x128xf32>, vector<8x128xf32> -> vector<8x128xf32>
    %12 = arith.addf %10, %11 : vector<8x128xf32>
    %13 = arith.negf %12 : vector<8x128xf32>
    %14 = math.exp %13 : vector<8x128xf32>
    %cst_14 = arith.constant 1.000000e+00 : f32
    %15 = vector.broadcast %cst_14 : f32 to vector<8x128xf32>
    %16 = arith.addf %15, %14 : vector<8x128xf32>
    %17 = arith.divf %15, %16 : vector<8x128xf32>
    %18 = math.tanh %12 : vector<8x128xf32>
    %19 = vector.extract_strided_slice %17 {offsets = [0, 0], sizes = [8, 32], strides = [1, 1]} : vector<8x128xf32> to vector<8x32xf32>
    %20 = vector.extract_strided_slice %17 {offsets = [0, 32], sizes = [8, 32], strides = [1, 1]} : vector<8x128xf32> to vector<8x32xf32>
    %21 = vector.extract_strided_slice %18 {offsets = [0, 64], sizes = [8, 32], strides = [1, 1]} : vector<8x128xf32> to vector<8x32xf32>
    %22 = vector.extract_strided_slice %17 {offsets = [0, 96], sizes = [8, 32], strides = [1, 1]} : vector<8x128xf32> to vector<8x32xf32>
    %23 = arith.mulf %20, %9 : vector<8x32xf32>
    %24 = arith.mulf %19, %21 : vector<8x32xf32>
    %25 = arith.addf %23, %24 : vector<8x32xf32>
    %26 = math.tanh %25 : vector<8x32xf32>
    %27 = arith.mulf %22, %26 : vector<8x32xf32>
    %c0_15 = arith.constant 0 : index
    %c0_16 = arith.constant 0 : index
    %28 = vector.load %arg8[%c0_15, %c0_16] : memref<64x32xf32, #tpu.memory_space<vmem>>, vector<8x32xf32>
    tpu.vector_store %arg8[%c0_15, %c0_16], %27 {strides = array<i32>} : memref<64x32xf32, #tpu.memory_space<vmem>>, vector<8x32xf32>,
    %c8 = arith.constant 8 : index
    %c0_17 = arith.constant 0 : index
    %29 = vector.load %arg7[%c8, %c0_17] : memref<64x128xf32, #tpu.memory_space<vmem>>, vector<8x128xf32>
    %cst_18 = arith.constant dense<0.000000e+00> : vector<8x128xf32>
    %30 = tpu.matmul %27, %7, %cst_18 {dimension_numbers = #tpu.dot_dimension_numbers<[1], [0], [0], [1], [0, 0, 1, 1], [], []>} : vector<8x32xf32>, vector<32x128xf32>, vector<8x128xf32> -> vector<8x128xf32>
    %31 = arith.addf %29, %30 : vector<8x128xf32>
    %32 = arith.negf %31 : vector<8x128xf32>
    %33 = math.exp %32 : vector<8x128xf32>
    %cst_19 = arith.constant 1.000000e+00 : f32
    %34 = vector.broadcast %cst_19 : f32 to vector<8x128xf32>
    %35 = arith.addf %34, %33 : vector<8x128xf32>
    %36 = arith.divf %34, %35 : vector<8x128xf32>
    %37 = math.tanh %31 : vector<8x128xf32>
    %38 = vector.extract_strided_slice %36 {offsets = [0, 0], sizes = [8, 32], strides = [1, 1]} : vector<8x128xf32> to vector<8x32xf32>
    %39 = vector.extract_strided_slice %36 {offsets = [0, 32], sizes = [8, 32], strides = [1, 1]} : vector<8x128xf32> to vector<8x32xf32>
    %40 = vector.extract_strided_slice %37 {offsets = [0, 64], sizes = [8, 32], strides = [1, 1]} : vector<8x128xf32> to vector<8x32xf32>
    %41 = vector.extract_strided_slice %36 {offsets = [0, 96], sizes = [8, 32], strides = [1, 1]} : vector<8x128xf32> to vector<8x32xf32>
    %42 = arith.mulf %39, %25 : vector<8x32xf32>
    %43 = arith.mulf %38, %40 : vector<8x32xf32>
    %44 = arith.addf %42, %43 : vector<8x32xf32>
    %45 = math.tanh %44 : vector<8x32xf32>
    %46 = arith.mulf %41, %45 : vector<8x32xf32>
    %c8_20 = arith.constant 8 : index
    %c0_21 = arith.constant 0 : index
    %47 = vector.load %arg8[%c8_20, %c0_21] : memref<64x32xf32, #tpu.memory_space<vmem>>, vector<8x32xf32>
    tpu.vector_store %arg8[%c8_20, %c0_21], %46 {strides = array<i32>} : memref<64x32xf32, #tpu.memory_space<vmem>>, vector<8x32xf32>,
    %c16 = arith.constant 16 : index
    %c0_22 = arith.constant 0 : index
    %48 = vector.load %arg7[%c16, %c0_22] : memref<64x128xf32, #tpu.memory_space<vmem>>, vector<8x128xf32>
    %cst_23 = arith.constant dense<0.000000e+00> : vector<8x128xf32>
    %49 = tpu.matmul %46, %7, %cst_23 {dimension_numbers = #tpu.dot_dimension_numbers<[1], [0], [0], [1], [0, 0, 1, 1], [], []>} : vector<8x32xf32>, vector<32x128xf32>, vector<8x128xf32> -> vector<8x128xf32>
    %50 = arith.addf %48, %49 : vector<8x128xf32>
    %51 = arith.negf %50 : vector<8x128xf32>
    %52 = math.exp %51 : vector<8x128xf32>
    %cst_24 = arith.constant 1.000000e+00 : f32
    %53 = vector.broadcast %cst_24 : f32 to vector<8x128xf32>
    %54 = arith.addf %53, %52 : vector<8x128xf32>
    %55 = arith.divf %53, %54 : vector<8x128xf32>
    %56 = math.tanh %50 : vector<8x128xf32>
    %57 = vector.extract_strided_slice %55 {offsets = [0, 0], sizes = [8, 32], strides = [1, 1]} : vector<8x128xf32> to vector<8x32xf32>
    %58 = vector.extract_strided_slice %55 {offsets = [0, 32], sizes = [8, 32], strides = [1, 1]} : vector<8x128xf32> to vector<8x32xf32>
    %59 = vector.extract_strided_slice %56 {offsets = [0, 64], sizes = [8, 32], strides = [1, 1]} : vector<8x128xf32> to vector<8x32xf32>
    %60 = vector.extract_strided_slice %55 {offsets = [0, 96], sizes = [8, 32], strides = [1, 1]} : vector<8x128xf32> to vector<8x32xf32>
    %61 = arith.mulf %58, %44 : vector<8x32xf32>
    %62 = arith.mulf %57, %59 : vector<8x32xf32>
    %63 = arith.addf %61, %62 : vector<8x32xf32>
    %64 = math.tanh %63 : vector<8x32xf32>
    %65 = arith.mulf %60, %64 : vector<8x32xf32>
    %c16_25 = arith.constant 16 : index
    %c0_26 = arith.constant 0 : index
    %66 = vector.load %arg8[%c16_25, %c0_26] : memref<64x32xf32, #tpu.memory_space<vmem>>, vector<8x32xf32>
    tpu.vector_store %arg8[%c16_25, %c0_26], %65 {strides = array<i32>} : memref<64x32xf32, #tpu.memory_space<vmem>>, vector<8x32xf32>,
    %c24 = arith.constant 24 : index
    %c0_27 = arith.constant 0 : index
    %67 = vector.load %arg7[%c24, %c0_27] : memref<64x128xf32, #tpu.memory_space<vmem>>, vector<8x128xf32>
    %cst_28 = arith.constant dense<0.000000e+00> : vector<8x128xf32>
    %68 = tpu.matmul %65, %7, %cst_28 {dimension_numbers = #tpu.dot_dimension_numbers<[1], [0], [0], [1], [0, 0, 1, 1], [], []>} : vector<8x32xf32>, vector<32x128xf32>, vector<8x128xf32> -> vector<8x128xf32>
    %69 = arith.addf %67, %68 : vector<8x128xf32>
    %70 = arith.negf %69 : vector<8x128xf32>
    %71 = math.exp %70 : vector<8x128xf32>
    %cst_29 = arith.constant 1.000000e+00 : f32
    %72 = vector.broadcast %cst_29 : f32 to vector<8x128xf32>
    %73 = arith.addf %72, %71 : vector<8x128xf32>
    %74 = arith.divf %72, %73 : vector<8x128xf32>
    %75 = math.tanh %69 : vector<8x128xf32>
    %76 = vector.extract_strided_slice %74 {offsets = [0, 0], sizes = [8, 32], strides = [1, 1]} : vector<8x128xf32> to vector<8x32xf32>
    %77 = vector.extract_strided_slice %74 {offsets = [0, 32], sizes = [8, 32], strides = [1, 1]} : vector<8x128xf32> to vector<8x32xf32>
    %78 = vector.extract_strided_slice %75 {offsets = [0, 64], sizes = [8, 32], strides = [1, 1]} : vector<8x128xf32> to vector<8x32xf32>
    %79 = vector.extract_strided_slice %74 {offsets = [0, 96], sizes = [8, 32], strides = [1, 1]} : vector<8x128xf32> to vector<8x32xf32>
    %80 = arith.mulf %77, %63 : vector<8x32xf32>
    %81 = arith.mulf %76, %78 : vector<8x32xf32>
    %82 = arith.addf %80, %81 : vector<8x32xf32>
    %83 = math.tanh %82 : vector<8x32xf32>
    %84 = arith.mulf %79, %83 : vector<8x32xf32>
    %c24_30 = arith.constant 24 : index
    %c0_31 = arith.constant 0 : index
    %85 = vector.load %arg8[%c24_30, %c0_31] : memref<64x32xf32, #tpu.memory_space<vmem>>, vector<8x32xf32>
    tpu.vector_store %arg8[%c24_30, %c0_31], %84 {strides = array<i32>} : memref<64x32xf32, #tpu.memory_space<vmem>>, vector<8x32xf32>,
    %c32 = arith.constant 32 : index
    %c0_32 = arith.constant 0 : index
    %86 = vector.load %arg7[%c32, %c0_32] : memref<64x128xf32, #tpu.memory_space<vmem>>, vector<8x128xf32>
    %cst_33 = arith.constant dense<0.000000e+00> : vector<8x128xf32>
    %87 = tpu.matmul %84, %7, %cst_33 {dimension_numbers = #tpu.dot_dimension_numbers<[1], [0], [0], [1], [0, 0, 1, 1], [], []>} : vector<8x32xf32>, vector<32x128xf32>, vector<8x128xf32> -> vector<8x128xf32>
    %88 = arith.addf %86, %87 : vector<8x128xf32>
    %89 = arith.negf %88 : vector<8x128xf32>
    %90 = math.exp %89 : vector<8x128xf32>
    %cst_34 = arith.constant 1.000000e+00 : f32
    %91 = vector.broadcast %cst_34 : f32 to vector<8x128xf32>
    %92 = arith.addf %91, %90 : vector<8x128xf32>
    %93 = arith.divf %91, %92 : vector<8x128xf32>
    %94 = math.tanh %88 : vector<8x128xf32>
    %95 = vector.extract_strided_slice %93 {offsets = [0, 0], sizes = [8, 32], strides = [1, 1]} : vector<8x128xf32> to vector<8x32xf32>
    %96 = vector.extract_strided_slice %93 {offsets = [0, 32], sizes = [8, 32], strides = [1, 1]} : vector<8x128xf32> to vector<8x32xf32>
    %97 = vector.extract_strided_slice %94 {offsets = [0, 64], sizes = [8, 32], strides = [1, 1]} : vector<8x128xf32> to vector<8x32xf32>
    %98 = vector.extract_strided_slice %93 {offsets = [0, 96], sizes = [8, 32], strides = [1, 1]} : vector<8x128xf32> to vector<8x32xf32>
    %99 = arith.mulf %96, %82 : vector<8x32xf32>
    %100 = arith.mulf %95, %97 : vector<8x32xf32>
    %101 = arith.addf %99, %100 : vector<8x32xf32>
    %102 = math.tanh %101 : vector<8x32xf32>
    %103 = arith.mulf %98, %102 : vector<8x32xf32>
    %c32_35 = arith.constant 32 : index
    %c0_36 = arith.constant 0 : index
    %104 = vector.load %arg8[%c32_35, %c0_36] : memref<64x32xf32, #tpu.memory_space<vmem>>, vector<8x32xf32>
    tpu.vector_store %arg8[%c32_35, %c0_36], %103 {strides = array<i32>} : memref<64x32xf32, #tpu.memory_space<vmem>>, vector<8x32xf32>,
    %c40 = arith.constant 40 : index
    %c0_37 = arith.constant 0 : index
    %105 = vector.load %arg7[%c40, %c0_37] : memref<64x128xf32, #tpu.memory_space<vmem>>, vector<8x128xf32>
    %cst_38 = arith.constant dense<0.000000e+00> : vector<8x128xf32>
    %106 = tpu.matmul %103, %7, %cst_38 {dimension_numbers = #tpu.dot_dimension_numbers<[1], [0], [0], [1], [0, 0, 1, 1], [], []>} : vector<8x32xf32>, vector<32x128xf32>, vector<8x128xf32> -> vector<8x128xf32>
    %107 = arith.addf %105, %106 : vector<8x128xf32>
    %108 = arith.negf %107 : vector<8x128xf32>
    %109 = math.exp %108 : vector<8x128xf32>
    %cst_39 = arith.constant 1.000000e+00 : f32
    %110 = vector.broadcast %cst_39 : f32 to vector<8x128xf32>
    %111 = arith.addf %110, %109 : vector<8x128xf32>
    %112 = arith.divf %110, %111 : vector<8x128xf32>
    %113 = math.tanh %107 : vector<8x128xf32>
    %114 = vector.extract_strided_slice %112 {offsets = [0, 0], sizes = [8, 32], strides = [1, 1]} : vector<8x128xf32> to vector<8x32xf32>
    %115 = vector.extract_strided_slice %112 {offsets = [0, 32], sizes = [8, 32], strides = [1, 1]} : vector<8x128xf32> to vector<8x32xf32>
    %116 = vector.extract_strided_slice %113 {offsets = [0, 64], sizes = [8, 32], strides = [1, 1]} : vector<8x128xf32> to vector<8x32xf32>
    %117 = vector.extract_strided_slice %112 {offsets = [0, 96], sizes = [8, 32], strides = [1, 1]} : vector<8x128xf32> to vector<8x32xf32>
    %118 = arith.mulf %115, %101 : vector<8x32xf32>
    %119 = arith.mulf %114, %116 : vector<8x32xf32>
    %120 = arith.addf %118, %119 : vector<8x32xf32>
    %121 = math.tanh %120 : vector<8x32xf32>
    %122 = arith.mulf %117, %121 : vector<8x32xf32>
    %c40_40 = arith.constant 40 : index
    %c0_41 = arith.constant 0 : index
    %123 = vector.load %arg8[%c40_40, %c0_41] : memref<64x32xf32, #tpu.memory_space<vmem>>, vector<8x32xf32>
    tpu.vector_store %arg8[%c40_40, %c0_41], %122 {strides = array<i32>} : memref<64x32xf32, #tpu.memory_space<vmem>>, vector<8x32xf32>,
    %c48 = arith.constant 48 : index
    %c0_42 = arith.constant 0 : index
    %124 = vector.load %arg7[%c48, %c0_42] : memref<64x128xf32, #tpu.memory_space<vmem>>, vector<8x128xf32>
    %cst_43 = arith.constant dense<0.000000e+00> : vector<8x128xf32>
    %125 = tpu.matmul %122, %7, %cst_43 {dimension_numbers = #tpu.dot_dimension_numbers<[1], [0], [0], [1], [0, 0, 1, 1], [], []>} : vector<8x32xf32>, vector<32x128xf32>, vector<8x128xf32> -> vector<8x128xf32>
    %126 = arith.addf %124, %125 : vector<8x128xf32>
    %127 = arith.negf %126 : vector<8x128xf32>
    %128 = math.exp %127 : vector<8x128xf32>
    %cst_44 = arith.constant 1.000000e+00 : f32
    %129 = vector.broadcast %cst_44 : f32 to vector<8x128xf32>
    %130 = arith.addf %129, %128 : vector<8x128xf32>
    %131 = arith.divf %129, %130 : vector<8x128xf32>
    %132 = math.tanh %126 : vector<8x128xf32>
    %133 = vector.extract_strided_slice %131 {offsets = [0, 0], sizes = [8, 32], strides = [1, 1]} : vector<8x128xf32> to vector<8x32xf32>
    %134 = vector.extract_strided_slice %131 {offsets = [0, 32], sizes = [8, 32], strides = [1, 1]} : vector<8x128xf32> to vector<8x32xf32>
    %135 = vector.extract_strided_slice %132 {offsets = [0, 64], sizes = [8, 32], strides = [1, 1]} : vector<8x128xf32> to vector<8x32xf32>
    %136 = vector.extract_strided_slice %131 {offsets = [0, 96], sizes = [8, 32], strides = [1, 1]} : vector<8x128xf32> to vector<8x32xf32>
    %137 = arith.mulf %134, %120 : vector<8x32xf32>
    %138 = arith.mulf %133, %135 : vector<8x32xf32>
    %139 = arith.addf %137, %138 : vector<8x32xf32>
    %140 = math.tanh %139 : vector<8x32xf32>
    %141 = arith.mulf %136, %140 : vector<8x32xf32>
    %c48_45 = arith.constant 48 : index
    %c0_46 = arith.constant 0 : index
    %142 = vector.load %arg8[%c48_45, %c0_46] : memref<64x32xf32, #tpu.memory_space<vmem>>, vector<8x32xf32>
    tpu.vector_store %arg8[%c48_45, %c0_46], %141 {strides = array<i32>} : memref<64x32xf32, #tpu.memory_space<vmem>>, vector<8x32xf32>,
    %c56 = arith.constant 56 : index
    %c0_47 = arith.constant 0 : index
    %143 = vector.load %arg7[%c56, %c0_47] : memref<64x128xf32, #tpu.memory_space<vmem>>, vector<8x128xf32>
    %cst_48 = arith.constant dense<0.000000e+00> : vector<8x128xf32>
    %144 = tpu.matmul %141, %7, %cst_48 {dimension_numbers = #tpu.dot_dimension_numbers<[1], [0], [0], [1], [0, 0, 1, 1], [], []>} : vector<8x32xf32>, vector<32x128xf32>, vector<8x128xf32> -> vector<8x128xf32>
    %145 = arith.addf %143, %144 : vector<8x128xf32>
    %146 = arith.negf %145 : vector<8x128xf32>
    %147 = math.exp %146 : vector<8x128xf32>
    %cst_49 = arith.constant 1.000000e+00 : f32
    %148 = vector.broadcast %cst_49 : f32 to vector<8x128xf32>
    %149 = arith.addf %148, %147 : vector<8x128xf32>
    %150 = arith.divf %148, %149 : vector<8x128xf32>
    %151 = math.tanh %145 : vector<8x128xf32>
    %152 = vector.extract_strided_slice %150 {offsets = [0, 0], sizes = [8, 32], strides = [1, 1]} : vector<8x128xf32> to vector<8x32xf32>
    %153 = vector.extract_strided_slice %150 {offsets = [0, 32], sizes = [8, 32], strides = [1, 1]} : vector<8x128xf32> to vector<8x32xf32>
    %154 = vector.extract_strided_slice %151 {offsets = [0, 64], sizes = [8, 32], strides = [1, 1]} : vector<8x128xf32> to vector<8x32xf32>
    %155 = vector.extract_strided_slice %150 {offsets = [0, 96], sizes = [8, 32], strides = [1, 1]} : vector<8x128xf32> to vector<8x32xf32>
    %156 = arith.mulf %153, %139 : vector<8x32xf32>
    %157 = arith.mulf %152, %154 : vector<8x32xf32>
    %158 = arith.addf %156, %157 : vector<8x32xf32>
    %159 = math.tanh %158 : vector<8x32xf32>
    %160 = arith.mulf %155, %159 : vector<8x32xf32>
    %c56_50 = arith.constant 56 : index
    %c0_51 = arith.constant 0 : index
    %161 = vector.load %arg8[%c56_50, %c0_51] : memref<64x32xf32, #tpu.memory_space<vmem>>, vector<8x32xf32>
    tpu.vector_store %arg8[%c56_50, %c0_51], %160 {strides = array<i32>} : memref<64x32xf32, #tpu.memory_space<vmem>>, vector<8x32xf32>,
    %c0_52 = arith.constant 0 : index
    %c0_53 = arith.constant 0 : index
    %162 = vector.load %arg8[%c0_52, %c0_53] : memref<64x32xf32, #tpu.memory_space<vmem>>, vector<64x32xf32>
    %c0_54 = arith.constant 0 : index
    %c0_55 = arith.constant 0 : index
    %163 = vector.load %arg4[%c0_54, %c0_55] : memref<32x128xf32, #tpu.memory_space<vmem>>, vector<32x128xf32>
    %cst_56 = arith.constant dense<0.000000e+00> : vector<64x128xf32>
    %164 = tpu.matmul %162, %163, %cst_56 {dimension_numbers = #tpu.dot_dimension_numbers<[1], [0], [0], [1], [0, 0, 1, 1], [], []>} : vector<64x32xf32>, vector<32x128xf32>, vector<64x128xf32> -> vector<64x128xf32>
    %c0_57 = arith.constant 0 : index
    %c0_58 = arith.constant 0 : index
    %165 = vector.load %arg5[%c0_57, %c0_58] : memref<1x128xf32, #tpu.memory_space<vmem>>, vector<1x128xf32>
    %166 = vector.broadcast %165 : vector<1x128xf32> to vector<64x128xf32>
    %167 = arith.addf %164, %166 : vector<64x128xf32>
    %c0_59 = arith.constant 0 : index
    %c0_60 = arith.constant 0 : index
    %168 = vector.load %arg6[%c0_59, %c0_60] : memref<64x128xf32, #tpu.memory_space<vmem>>, vector<64x128xf32>
    tpu.vector_store %arg6[%c0_59, %c0_60], %167 {strides = array<i32>} : memref<64x128xf32, #tpu.memory_space<vmem>>, vector<64x128xf32>,
    return
  }
}

</mosaic_0001>

<bundles_post_ra>
// kernel: tpu_custom_call.1
= control target key start
LH: loop header
LB: loop body
LE: loop exit
PB: predicated region body
PF: predicated region fallthrough
CT: control target
= control target key end

     0   :  { %vm41_vm0 = vcmask 130048   ;;  %s1825_s0 = inlined_call_operand.vmem [shape: f32[64,16], index: 0, kind: input, shape index: {}]   ;;  %s1826_s1 = inlined_call_operand.vmem [shape: f32[16,128], index: 1, kind: input, shape index: {}]   ;;  %s1827_s2 = inlined_call_operand.vmem [shape: f32[32,128], index: 2, kind: input, shape index: {}]   ;;  %s1828_s3 = inlined_call_operand.vmem [shape: f32[1,128], index: 3, kind: input, shape index: {}]   ;;  %s1829_s4 = inlined_call_operand.vmem [shape: f32[32,128], index: 4, kind: input, shape index: {}]   ;;  %s1830_s5 = inlined_call_operand.vmem [shape: f32[1,128], index: 5, kind: input, shape index: {}]   ;;  %s1831_s6 = inlined_call_operand.hbm [shape: f32[64,128], index: 6, kind: output, shape index: {}]  }
   0x1   :  { %v32_v0 = vld [vmem:[%s1826_s1] sm:$0xff]  ;;  %v33_v1 = vld [vmem:[%s1826_s1 + $0x8] sm:$0xff] }
   0x2   :  { %v28_v2 = vld [vmem:[%s1825_s0 + $0x20] sm:$0xff]  ;;  %v1400_v3 = vpack.c.bf16 %v33_v1, %v32_v0  ;;  %v180_v5 = vld [vmem:[%s1827_s2 + $0x8] sm:$0xff] }
   0x3   :  { %1286 = vmatprep.mubr.msk.f32.mxu1 %vm41_vm0, %v28_v2  ;;  %v179_v4 = vld [vmem:[%s1827_s2] sm:$0xff]  ;;  %v29_v7 = vld [vmem:[%s1825_s0 + $0x28] sm:$0xff] }
   0x4   :  { %v24_v6 = vld [vmem:[%s1825_s0] sm:$0xff]  ;;  %1460 = vmatprep.subr.bf16.mxu1 %v1400_v3  ;;  %1401 = vmatprep.subr.bf16.mxu0 %v1400_v3  ;;  %v1623_v8 = vpack.c.bf16 %v180_v5, %v179_v4  ;;  %v25_v9 = vld [vmem:[%s1825_s0 + $0x8] sm:$0xff] }
   0x5   :  { %1461 = vmatpush3.bf16.msra.mxu1 %v1400_v3  ;;  %1403 = vmatpush3.bf16.msra.mxu0 %v1400_v3 }
   0x6   :  { %11 = vsyncpa [#allocation5], 0  ;;  %v1558_v10 = vmov 0.0|0.0   ;;  %v30_v11 = vld [vmem:[%s1825_s0 + $0x30] sm:$0xff]  ;;  %1280 = vmatprep.mubr.msk.f32.mxu0 %vm41_vm0, %v24_v6  ;;  %v182_v13 = vld [vmem:[%s1827_s2 + $0x18] sm:$0xff]  ;;  %vm1559_vm1 = vmmov 0  }
   0x7   :  { %1404 = vmatprep.subr.bf16.mxu1 %v1558_v10  ;;  %v181_v12 = vld [vmem:[%s1827_s2 + $0x10] sm:$0xff]  ;;  %1416 = vmatprep.subr.bf16.mxu0 %v1558_v10  ;;  %v31_v14 = vld [vmem:[%s1825_s0 + $0x38] sm:$0xff]  ;;  %v1560_v16 = vmov 0.0   ;;  %v1673_v21 = vld [vmem:[%s1828_s3] ss:$0 sm:$0xff]  ;;  %s1561_s21 = smov 64  }
   0x8   :  { %1287 = vmatmul.mubr.msk.f32.vlgmr.msra.gmra.mrb[0].mxu1 %vm41_vm0, %v29_v7  ;;  %1281 = vmatmul.mubr.msk.f32.vlgmr.msra.gmra.mrb[0].mxu0 %vm41_vm0, %v25_v9  ;;  %v1647_v15 = vpack.c.bf16 %v182_v13, %v181_v12  ;;  %s1562_s3 = smov 32   ;;  %vm184_vm2 = vcmask 261120   ;;  %v26_v56 = vld [vmem:[%s1825_s0 + $0x10] sm:$0xff]  ;;  %v27_v57 = vld [vmem:[%s1825_s0 + $0x18] sm:$0xff] }
   0x9   :  { %1406 = vmatpush3.bf16.msra.mxu1 %v1623_v8  ;;  %1289 = vmatprep.mubr.msk.f32.mxu1 %vm41_vm0, %v30_v11 }
   0xa   :  { %1407 = vmatprep.subr.bf16.mxu1 %v1558_v10  ;;  %1418 = vmatpush3.bf16.msra.mxu0 %v1623_v8 }
   0xb   :  { %1419 = vmatprep.subr.bf16.mxu0 %v1558_v10  ;;  %1283 = vmatprep.mubr.msk.f32.mxu0 %vm41_vm0, %v26_v56 }
   0xc   :  { %1290 = vmatmul.mubr.msk.f32.gmra.mrb[2].mxu1 %vm41_vm0, %v31_v14  ;;  %1284 = vmatmul.mubr.msk.f32.gmra.mrb[2].mxu0 %vm41_vm0, %v27_v57 }
   0xd   :  { %1409 = vmatpush3.bf16.msra.mxu1 %v1647_v15  ;;  %1300 = vmatprep.mubr.msk.f32.mxu1 %vm1559_vm1, %v1560_v16 }
   0xe   :  { %1410 = vmatprep.subr.bf16.mxu1 %v1558_v10  ;;  %1421 = vmatpush3.bf16.msra.mxu0 %v1647_v15 }
   0xf   :  { %1428 = vmatprep.subr.bf16.mxu0 %v1558_v10  ;;  %1322 = vmatprep.mubr.msk.f32.mxu0 %vm1559_vm1, %v1560_v16 }
  0x10   :  { %1301 = vmatmul.mubr.f32.vlgmr.msra.gmra.mrb[4].mxu1 %v1560_v16 }
  0x11   :  { %1412 = vmatpush3.bf16.msra.mxu1 %v1623_v8  ;;  %1311 = vmatprep.mubr.msk.f32.mxu1 %vm1559_vm1, %v1560_v16 }
  0x12   :  { %1413 = vmatprep.subr.bf16.mxu1 %v1558_v10 }
  0x15   :  { %1415 = vmatpush3.bf16.msra.mxu1 %v1647_v15 }
  0x16   :  { %1422 = vmatprep.subr.bf16.mxu1 %v1558_v10 }
  0xdb   :  { %v1666_v17 = vpop.f32.mrb[0].mxu1  ;;  %v1282_v18 = vpop.f32.mrb[0].mxu0 }
  0xdc   :  { %v1668_v19 = vpop.f32.mrb[1].mxu1  ;;  %v132_v20 = vpop.f32.mrb[1].mxu0  ;;  %v138_v42 = vadd.f32 %v1282_v18, %v1673_v21 }
  0xdd   :  { %v133_v24 = vadd.f32 %v1673_v21, %v132_v20 }
  0xdf   :  { %v1675_v22 = vpop.f32.mrb[2].mxu1  ;;  %v1285_v61 = vpop.f32.mrb[2].mxu0 }
  0xe0   :  { %v1677_v23 = vpop.f32.mrb[3].mxu1  ;;  %v142_v62 = vpop.f32.mrb[3].mxu0 }
  0xe1   :  { %v143_v0 = vadd.f32 %v1673_v21, %v142_v62  ;;  %v158_v62 = vadd.f32 %v1666_v17, %v1673_v21 }
  0xe3   :  { %v254_v25 = vpop.f32.mrb[4].mxu1 }
  0xe4   :  { %v258_v26 = vadd.f32 %v254_v25, %v133_v24  ;;  %v1302_v27 = vpop.f32.mrb[5].mxu1 }
  0xe5   :  { %v148_v27 = vadd.f32 %v1285_v61, %v1673_v21 }
  0xe6   :  { %1470 = vtanh.f32 %v258_v26  ;;  %v1190_v29 = vmul.f32 -1.442695, %v258_v26 }
  0xe8   :  { %1472 = vpow2.f32 %v1190_v29 }
  0xf0   :  { %v1471_v28 = vpop.eup %1470 }
  0xf1   :  { %268 = vrot.lane.b32.xlu0 %v1471_v28, %s1561_s21 }
  0xf2   :  { %v1473_v30 = vpop.eup %1472 }
  0xf3   :  { %v262_v31 = vadd.f32 1.0, %v1473_v30 }
  0xf5   :  { %1474 = vrcp.f32 %v262_v31 }
  0xff   :  { %v1475_v32 = vpop.eup %1474 }
 0x100   :  { %v266_v35 = vmul.f32 0.0, %v1475_v32 }
 0x163   :  { %v269_v33 = vpop.permute.xlu0 %268 }
 0x164   :  { %v271_v34 = vmul.f32 %v1475_v32, %v269_v33 }
 0x166   :  { %273 = vrot.lane.b32.xlu0 %v271_v34, %s1562_s3 }
 0x1d8   :  { %v274_v36 = vpop.permute.xlu0 %273 }
 0x1d9   :  { %v276_v37 = vadd.f32 %v274_v36, %v266_v35 }
 0x1db   :  { %1476 = vtanh.f32 %v276_v37 }
 0x1e5   :  { %v1477_v38 = vpop.eup %1476 }
 0x1e6   :  { %279 = vrot.lane.b32.xlu1 %v1477_v38, %s1561_s21 }
 0x258   :  { %v280_v39 = vpop.permute.xlu1 %279 }
 0x259   :  { %v282_v40 = vmul.f32 %v1475_v32, %v280_v39 }
 0x25b   :  { %284 = vrot.lane.b32.xlu1 %v282_v40, %s1562_s3 }
 0x2cd   :  { %v285_v41 = vpop.permute.xlu1 %284 }
 0x2ce   :  { %287 = vst.msk [vmem:[#allocation3] sm:$0xff] %vm184_vm2, %v285_v41  ;;  %1312 = vmatmul.mubr.msk.f32.vlgmr.msra.gmra.mrb[6].mxu1 %vm184_vm2, %v285_v41 }
 0x2cf   :  { %1424 = vmatpush3.bf16.msra.mxu1 %v1623_v8  ;;  %1333 = vmatprep.mubr.msk.f32.mxu1 %vm1559_vm1, %v1560_v16 }
 0x2d0   :  { %1425 = vmatprep.subr.bf16.mxu1 %v1558_v10 }
 0x2d3   :  { %1427 = vmatpush3.bf16.msra.mxu1 %v1647_v15 }
 0x2d4   :  { %1434 = vmatprep.subr.bf16.mxu1 %v1558_v10 }
 0x3a1   :  { %v357_v43 = vpop.f32.mrb[6].mxu1 }
 0x3a2   :  { %v361_v44 = vadd.f32 %v357_v43, %v138_v42  ;;  %v1313_v45 = vpop.f32.mrb[7].mxu1 }
 0x3a3   :  { %v153_v45 = vadd.f32 %v1673_v21, %v1668_v19 }
 0x3a4   :  { %1478 = vtanh.f32 %v361_v44  ;;  %v1192_v47 = vmul.f32 -1.442695, %v361_v44 }
 0x3a6   :  { %1480 = vpow2.f32 %v1192_v47 }
 0x3ae   :  { %v1479_v46 = vpop.eup %1478 }
 0x3af   :  { %371 = vrot.lane.b32.xlu0 %v1479_v46, %s1561_s21 }
 0x3b0   :  { %v1481_v48 = vpop.eup %1480 }
 0x3b1   :  { %v365_v49 = vadd.f32 1.0, %v1481_v48 }
 0x3b3   :  { %1482 = vrcp.f32 %v365_v49 }
 0x3bd   :  { %v1483_v50 = vpop.eup %1482 }
 0x3be   :  { %v369_v53 = vmul.f32 %v1483_v50, %v276_v37 }
 0x421   :  { %v372_v51 = vpop.permute.xlu0 %371 }
 0x422   :  { %v374_v52 = vmul.f32 %v1483_v50, %v372_v51 }
 0x424   :  { %376 = vrot.lane.b32.xlu1 %v374_v52, %s1562_s3 }
 0x496   :  { %v377_v54 = vpop.permute.xlu1 %376 }
 0x497   :  { %v379_v55 = vadd.f32 %v377_v54, %v369_v53 }
 0x499   :  { %1484 = vtanh.f32 %v379_v55 }
 0x4a3   :  { %v1485_v58 = vpop.eup %1484 }
 0x4a4   :  { %382 = vrot.lane.b32.xlu0 %v1485_v58, %s1561_s21 }
 0x516   :  { %v383_v59 = vpop.permute.xlu0 %382 }
 0x517   :  { %v385_v60 = vmul.f32 %v1483_v50, %v383_v59 }
 0x519   :  { %387 = vrot.lane.b32.xlu1 %v385_v60, %s1562_s3 }
 0x58b   :  { %v388_v63 = vpop.permute.xlu1 %387 }
 0x58c   :  { %390 = vst.msk [vmem:[#allocation3 + $0x8] sm:$0xff] %vm184_vm2, %v388_v63  ;;  %1323 = vmatmul.mubr.msk.f32.vlgmr.msra.gmra.mrb[4].mxu0 %vm184_vm2, %v388_v63 }
 0x58d   :  { %1430 = vmatpush3.bf16.msra.mxu0 %v1623_v8  ;;  %1344 = vmatprep.mubr.msk.f32.mxu0 %vm1559_vm1, %v1560_v16 }
 0x58e   :  { %1431 = vmatprep.subr.bf16.mxu0 %v1558_v10 }
 0x591   :  { %1433 = vmatpush3.bf16.msra.mxu0 %v1647_v15 }
 0x592   :  { %1440 = vmatprep.subr.bf16.mxu0 %v1558_v10 }
 0x65f   :  { %v460_v1 = vpop.f32.mrb[4].mxu0 }
 0x660   :  { %v464_v2 = vadd.f32 %v460_v1, %v143_v0  ;;  %v1324_v3 = vpop.f32.mrb[5].mxu0 }
 0x662   :  { %1486 = vtanh.f32 %v464_v2  ;;  %v1194_v5 = vmul.f32 -1.442695, %v464_v2 }
 0x664   :  { %1488 = vpow2.f32 %v1194_v5 }
 0x66c   :  { %v1487_v4 = vpop.eup %1486 }
 0x66d   :  { %474 = vrot.lane.b32.xlu0 %v1487_v4, %s1561_s21 }
 0x66e   :  { %v1489_v6 = vpop.eup %1488 }
 0x66f   :  { %v468_v7 = vadd.f32 1.0, %v1489_v6 }
 0x671   :  { %1490 = vrcp.f32 %v468_v7  ;;  %v1017_v7 = vld [vmem:[%s1829_s4] sm:$0xff] }
 0x67b   :  { %v1491_v9 = vpop.eup %1490 }
 0x67c   :  { %v472_v13 = vmul.f32 %v1491_v9, %v379_v55 }
 0x6df   :  { %v475_v11 = vpop.permute.xlu0 %474 }
 0x6e0   :  { %v477_v12 = vmul.f32 %v1491_v9, %v475_v11 }
 0x6e2   :  { %479 = vrot.lane.b32.xlu1 %v477_v12, %s1562_s3 }
 0x754   :  { %v480_v14 = vpop.permute.xlu1 %479 }
 0x755   :  { %v482_v18 = vadd.f32 %v480_v14, %v472_v13 }
 0x757   :  { %1492 = vtanh.f32 %v482_v18 }
 0x761   :  { %v1493_v20 = vpop.eup %1492 }
 0x762   :  { %485 = vrot.lane.b32.xlu0 %v1493_v20, %s1561_s21  ;;  %v1020_v20 = vld [vmem:[%s1829_s4 + $0x18] sm:$0xff] }
 0x7d4   :  { %v486_v24 = vpop.permute.xlu0 %485 }
 0x7d5   :  { %v488_v25 = vmul.f32 %v1491_v9, %v486_v24  ;;  %v1018_v9 = vld [vmem:[%s1829_s4 + $0x8] sm:$0xff] }
 0x7d6   :  { %v1452_v11 = vpack.c.bf16 %v1018_v9, %v1017_v7 }
 0x7d7   :  { %490 = vrot.lane.b32.xlu1 %v488_v25, %s1562_s3 }
 0x849   :  { %v491_v26 = vpop.permute.xlu1 %490 }
 0x84a   :  { %493 = vst.msk [vmem:[#allocation3 + $0x10] sm:$0xff] %vm184_vm2, %v491_v26  ;;  %1334 = vmatmul.mubr.msk.f32.vlgmr.msra.gmra.mrb[8].mxu1 %vm184_vm2, %v491_v26  ;;  %v1009_v26 = vld [vmem:[#allocation3] sm:$0xff] }
 0x84b   :  { %1436 = vmatpush3.bf16.msra.mxu1 %v1623_v8  ;;  %1355 = vmatprep.mubr.msk.f32.mxu1 %vm1559_vm1, %v1560_v16 }
 0x84c   :  { %1437 = vmatprep.subr.bf16.mxu1 %v1558_v10 }
 0x84f   :  { %1439 = vmatpush3.bf16.msra.mxu1 %v1647_v15 }
 0x850   :  { %1446 = vmatprep.subr.bf16.mxu1 %v1558_v10 }
 0x91d   :  { %v563_v28 = vpop.f32.mrb[8].mxu1 }
 0x91e   :  { %v567_v29 = vadd.f32 %v563_v28, %v148_v27  ;;  %v1335_v30 = vpop.f32.mrb[9].mxu1  ;;  %v1010_v27 = vld [vmem:[#allocation3 + $0x8] sm:$0xff]  ;;  %v1011_v28 = vld [vmem:[#allocation3 + $0x10] sm:$0xff] }
 0x920   :  { %1494 = vtanh.f32 %v567_v29  ;;  %v1196_v32 = vmul.f32 -1.442695, %v567_v29 }
 0x922   :  { %1496 = vpow2.f32 %v1196_v32  ;;  %v163_v32 = vadd.f32 %v1673_v21, %v1677_v23 }
 0x92a   :  { %v1495_v31 = vpop.eup %1494 }
 0x92b   :  { %577 = vrot.lane.b32.xlu0 %v1495_v31, %s1561_s21 }
 0x92c   :  { %v1497_v33 = vpop.eup %1496 }
 0x92d   :  { %v571_v34 = vadd.f32 1.0, %v1497_v33 }
 0x92f   :  { %1498 = vrcp.f32 %v571_v34 }
 0x939   :  { %v1499_v35 = vpop.eup %1498 }
 0x93a   :  { %v575_v38 = vmul.f32 %v1499_v35, %v482_v18  ;;  %v1019_v18 = vld [vmem:[%s1829_s4 + $0x10] sm:$0xff] }
 0x93b   :  { %v1456_v24 = vpack.c.bf16 %v1020_v20, %v1019_v18 }
 0x99d   :  { %v578_v36 = vpop.permute.xlu0 %577 }
 0x99e   :  { %v580_v37 = vmul.f32 %v1499_v35, %v578_v36  ;;  %v1787_v36 = vld [vmem:[%s1830_s5] ss:$0 sm:$0xff]  ;;  %s1563_s5 = smov [#allocation4]  }
 0x99f   :  { %s1170_s9 = sshll.u32 %s1563_s5, 4  ;;  %s1171_s9 = int_to_ptr.vmem [resolvable:$true] %s1170_s9 }
 0x9a0   :  { %582 = vrot.lane.b32.xlu1 %v580_v37, %s1562_s3  ;;  %s1534_s10 = scalar_lea.vmem %s1171_s9, 1024  ;;  %p1539_p1 = scmp.lt.s32.totalorder %s1171_s9, %s1171_s9 }
 0x9a1   :  { %p1535_p0 = scmp.ne.s32.totalorder %s1171_s9, %s1534_s10  ;;  %p1540_p2 = scmp.lt.s32.totalorder %s1534_s10, %s1534_s10 }
 0x9a3   :  { %p1541_p3 = por %p1540_p2, %p1539_p1 }
 0x9a5   :  { %p1542_p4 = pnand %p1541_p3, %p1535_p0 }
 0xa12   :  { %v583_v39 = vpop.permute.xlu1 %582 }
 0xa13   :  { %v585_v40 = vadd.f32 %v583_v39, %v575_v38 }
 0xa15   :  { %1500 = vtanh.f32 %v585_v40 }
 0xa1f   :  { %v1501_v41 = vpop.eup %1500 }
 0xa20   :  { %588 = vrot.lane.b32.xlu0 %v1501_v41, %s1561_s21 }
 0xa92   :  { %v589_v42 = vpop.permute.xlu0 %588 }
 0xa93   :  { %v591_v43 = vmul.f32 %v1499_v35, %v589_v42 }
 0xa95   :  { %593 = vrot.lane.b32.xlu1 %v591_v43, %s1562_s3 }
 0xb07   :  { %v594_v44 = vpop.permute.xlu1 %593 }
 0xb08   :  { %596 = vst.msk [vmem:[#allocation3 + $0x18] sm:$0xff] %vm184_vm2, %v594_v44  ;;  %1345 = vmatmul.mubr.msk.f32.vlgmr.msra.gmra.mrb[6].mxu0 %vm184_vm2, %v594_v44 }
 0xb09   :  { %1442 = vmatpush3.bf16.msra.mxu0 %v1623_v8  ;;  %1366 = vmatprep.mubr.msk.f32.mxu0 %vm1559_vm1, %v1560_v16 }
 0xb0a   :  { %1443 = vmatprep.subr.bf16.mxu0 %v1558_v10 }
 0xb0d   :  { %1445 = vmatpush3.bf16.msra.mxu0 %v1647_v15 }
 0xb0e   :  { %1453 = vmatprep.subr.bf16.mxu0 %v1452_v11 }
 0xb0f   :  { %v1012_v29 = vld [vmem:[#allocation3 + $0x18] sm:$0xff] }
 0xbdb   :  { %v666_v46 = vpop.f32.mrb[6].mxu0 }
 0xbdc   :  { %v670_v47 = vadd.f32 %v666_v46, %v153_v45  ;;  %v1346_v48 = vpop.f32.mrb[7].mxu0 }
 0xbde   :  { %1502 = vtanh.f32 %v670_v47  ;;  %v1198_v50 = vmul.f32 -1.442695, %v670_v47 }
 0xbe0   :  { %1504 = vpow2.f32 %v1198_v50 }
 0xbe8   :  { %v1503_v49 = vpop.eup %1502 }
 0xbe9   :  { %680 = vrot.lane.b32.xlu0 %v1503_v49, %s1561_s21 }
 0xbea   :  { %v1505_v51 = vpop.eup %1504 }
 0xbeb   :  { %v674_v52 = vadd.f32 1.0, %v1505_v51 }
 0xbed   :  { %1506 = vrcp.f32 %v674_v52 }
 0xbf7   :  { %v1507_v53 = vpop.eup %1506 }
 0xbf8   :  { %v678_v56 = vmul.f32 %v1507_v53, %v585_v40 }
 0xc5b   :  { %v681_v54 = vpop.permute.xlu0 %680 }
 0xc5c   :  { %v683_v55 = vmul.f32 %v1507_v53, %v681_v54 }
 0xc5e   :  { %685 = vrot.lane.b32.xlu1 %v683_v55, %s1562_s3 }
 0xcd0   :  { %v686_v57 = vpop.permute.xlu1 %685 }
 0xcd1   :  { %v688_v19 = vadd.f32 %v686_v57, %v678_v56 }
 0xcd3   :  { %1508 = vtanh.f32 %v688_v19 }
 0xcdd   :  { %v1509_v58 = vpop.eup %1508 }
 0xcde   :  { %691 = vrot.lane.b32.xlu0 %v1509_v58, %s1561_s21 }
 0xd50   :  { %v692_v59 = vpop.permute.xlu0 %691 }
 0xd51   :  { %v694_v60 = vmul.f32 %v1507_v53, %v692_v59 }
 0xd53   :  { %696 = vrot.lane.b32.xlu1 %v694_v60, %s1562_s3 }
 0xdc5   :  { %v697_v61 = vpop.permute.xlu1 %696 }
 0xdc6   :  { %699 = vst.msk [vmem:[#allocation3 + $0x20] sm:$0xff] %vm184_vm2, %v697_v61  ;;  %1356 = vmatmul.mubr.msk.f32.vlgmr.msra.gmra.mrb[10].mxu1 %vm184_vm2, %v697_v61 }
 0xdc7   :  { %1448 = vmatpush3.bf16.msra.mxu1 %v1623_v8  ;;  %1377 = vmatprep.mubr.msk.f32.mxu1 %vm1559_vm1, %v1560_v16 }
 0xdc8   :  { %1449 = vmatprep.subr.bf16.mxu1 %v1558_v10 }
 0xdcb   :  { %1451 = vmatpush3.bf16.msra.mxu1 %v1647_v15 }
 0xdcd   :  { %v1013_v30 = vld [vmem:[#allocation3 + $0x20] sm:$0xff] }
 0xe99   :  { %v769_v63 = vpop.f32.mrb[10].mxu1 }
 0xe9a   :  { %v773_v0 = vadd.f32 %v769_v63, %v158_v62  ;;  %v1357_v1 = vpop.f32.mrb[11].mxu1  ;;  %v168_v62 = vadd.f32 %v1675_v22, %v1673_v21 }
 0xe9c   :  { %1510 = vtanh.f32 %v773_v0  ;;  %v1200_v3 = vmul.f32 -1.442695, %v773_v0 }
 0xe9e   :  { %1512 = vpow2.f32 %v1200_v3 }
 0xea6   :  { %v1511_v2 = vpop.eup %1510 }
 0xea7   :  { %783 = vrot.lane.b32.xlu0 %v1511_v2, %s1561_s21 }
 0xea8   :  { %v1513_v8 = vpop.eup %1512 }
 0xea9   :  { %v777_v4 = vadd.f32 1.0, %v1513_v8 }
 0xeab   :  { %1514 = vrcp.f32 %v777_v4 }
 0xeb5   :  { %v1515_v16 = vpop.eup %1514 }
 0xeb6   :  { %v781_v15 = vmul.f32 %v1515_v16, %v688_v19 }
 0xf19   :  { %v784_v5 = vpop.permute.xlu0 %783 }
 0xf1a   :  { %v786_v10 = vmul.f32 %v1515_v16, %v784_v5 }
 0xf1c   :  { %788 = vrot.lane.b32.xlu1 %v786_v10, %s1562_s3 }
 0xf8e   :  { %v789_v6 = vpop.permute.xlu1 %788 }
 0xf8f   :  { %v1757_v17 = vadd.f32 %v789_v6, %v781_v15 }
 0xf91   :  { %1516 = vtanh.f32 %v1757_v17 }
 0xf9b   :  { %v1517_v12 = vpop.eup %1516 }
 0xf9c   :  { %794 = vrot.lane.b32.xlu0 %v1517_v12, %s1561_s21 }
0x100e   :  { %v795_v13 = vpop.permute.xlu0 %794 }
0x100f   :  { %v797_v14 = vmul.f32 %v1515_v16, %v795_v13 }
0x1011   :  { %799 = vrot.lane.b32.xlu1 %v797_v14, %s1562_s3 }
0x1083   :  { %v800_v25 = vpop.permute.xlu1 %799 }
0x1084   :  { %802 = vst.msk [vmem:[#allocation3 + $0x28] sm:$0xff] %vm184_vm2, %v800_v25  ;;  %1367 = vmatmul.mubr.msk.f32.vlgmr.msra.gmra.mrb[8].mxu0 %vm184_vm2, %v800_v25 }
0x1085   :  { %1455 = vmatpush3.bf16.msra.mxu0 %v1452_v11  ;;  %1388 = vmatprep.mubr.msk.f32.mxu0 %vm184_vm2, %v1009_v26 }
0x1086   :  { %1457 = vmatprep.subr.bf16.mxu0 %v1456_v24 }
0x1089   :  { %1459 = vmatpush3.bf16.msra.mxu0 %v1456_v24 }
0x108b   :  { %v1014_v31 = vld [vmem:[#allocation3 + $0x28] sm:$0xff] }
0x108c   :  { %1389 = vmatmul.mubr.msk.f32.vlgmr.msra.gmra.mrb[10].mxu0 %vm184_vm2, %v1010_v27 }
0x108d   :  { %1391 = vmatprep.mubr.msk.f32.mxu0 %vm184_vm2, %v1011_v28 }
0x1090   :  { %1392 = vmatmul.mubr.msk.f32.gmra.mrb[12].mxu0 %vm184_vm2, %v1012_v29 }
0x1091   :  { %1394 = vmatprep.mubr.msk.f32.mxu0 %vm184_vm2, %v1013_v30 }
0x1094   :  { %1395 = vmatmul.mubr.msk.f32.gmra.mrb[14].mxu0 %vm184_vm2, %v1014_v31 }
0x1157   :  { %v872_v33 = vpop.f32.mrb[8].mxu0 }
0x1158   :  { %v876_v34 = vadd.f32 %v872_v33, %v163_v32  ;;  %v1368_v35 = vpop.f32.mrb[9].mxu0 }
0x115a   :  { %1518 = vtanh.f32 %v876_v34  ;;  %v1202_v49 = vmul.f32 -1.442695, %v876_v34 }
0x115c   :  { %1520 = vpow2.f32 %v1202_v49 }
0x115f   :  { %v1390_v37 = vpop.f32.mrb[10].mxu0 }
0x1160   :  { %v1124_v38 = vadd.f32 %v1390_v37, %v1787_v36  ;;  %v1118_v39 = vpop.f32.mrb[11].mxu0 }
0x1161   :  { %v1119_v40 = vadd.f32 %v1787_v36, %v1118_v39 }
0x1162   :  { %1158 = vst [vmem:[#allocation4 + $0x8] sm:$0xff] %v1124_v38 }
0x1163   :  { %1157 = vst [vmem:[#allocation4] sm:$0xff] %v1119_v40  ;;  %v1393_v41 = vpop.f32.mrb[12].mxu0 }
0x1164   :  { %v1519_v42 = vpop.eup %1518  ;;  %v1134_v23 = vadd.f32 %v1393_v41, %v1787_v36  ;;  %v1128_v43 = vpop.f32.mrb[13].mxu0 }
0x1165   :  { %v1129_v44 = vadd.f32 %v1787_v36, %v1128_v43  ;;  %886 = vrot.lane.b32.xlu0 %v1519_v42, %s1561_s21 }
0x1166   :  { %1160 = vst [vmem:[#allocation4 + $0x18] sm:$0xff] %v1134_v23  ;;  %v1521_v50 = vpop.eup %1520 }
0x1167   :  { %1159 = vst [vmem:[#allocation4 + $0x10] sm:$0xff] %v1129_v44  ;;  %v1396_v45 = vpop.f32.mrb[14].mxu0  ;;  %v880_v51 = vadd.f32 1.0, %v1521_v50 }
0x1168   :  { %v1144_v46 = vadd.f32 %v1396_v45, %v1787_v36  ;;  %v1138_v47 = vpop.f32.mrb[15].mxu0 }
0x1169   :  { %v1139_v48 = vadd.f32 %v1787_v36, %v1138_v47  ;;  %1522 = vrcp.f32 %v880_v51 }
0x116a   :  { %1162 = vst [vmem:[#allocation4 + $0x28] sm:$0xff] %v1144_v46 }
0x116b   :  { %1161 = vst [vmem:[#allocation4 + $0x20] sm:$0xff] %v1139_v48 }
0x1173   :  { %v1523_v52 = vpop.eup %1522 }
0x1174   :  { %v884_v55 = vmul.f32 %v1523_v52, %v1757_v17 }
0x11d7   :  { %v887_v53 = vpop.permute.xlu0 %886 }
0x11d8   :  { %v889_v54 = vmul.f32 %v1523_v52, %v887_v53 }
0x11da   :  { %891 = vrot.lane.b32.xlu1 %v889_v54, %s1562_s3 }
0x124c   :  { %v892_v56 = vpop.permute.xlu1 %891 }
0x124d   :  { %v894_v57 = vadd.f32 %v892_v56, %v884_v55 }
0x124f   :  { %1524 = vtanh.f32 %v894_v57 }
0x1259   :  { %v1525_v19 = vpop.eup %1524 }
0x125a   :  { %897 = vrot.lane.b32.xlu0 %v1525_v19, %s1561_s21 }
0x12cc   :  { %v898_v58 = vpop.permute.xlu0 %897 }
0x12cd   :  { %v900_v59 = vmul.f32 %v1523_v52, %v898_v58 }
0x12cf   :  { %902 = vrot.lane.b32.xlu1 %v900_v59, %s1562_s3 }
0x1341   :  { %v903_v60 = vpop.permute.xlu1 %902 }
0x1342   :  { %905 = vst.msk [vmem:[#allocation3 + $0x30] sm:$0xff] %vm184_vm2, %v903_v60  ;;  %1378 = vmatmul.mubr.msk.f32.vlgmr.msra.gmra.mrb[12].mxu1 %vm184_vm2, %v903_v60 }
0x1349   :  { %v1015_v61 = vld [vmem:[#allocation3 + $0x30] sm:$0xff] }
0x134a   :  { %1397 = vmatprep.mubr.msk.f32.mxu0 %vm184_vm2, %v1015_v61 }
0x1415   :  { %v975_v63 = vpop.f32.mrb[12].mxu1 }
0x1416   :  { %v979_v0 = vadd.f32 %v975_v63, %v168_v62  ;;  %v1379_v1 = vpop.f32.mrb[13].mxu1 }
0x1418   :  { %1526 = vtanh.f32 %v979_v0  ;;  %v1204_v3 = vmul.f32 -1.442695, %v979_v0 }
0x141a   :  { %1528 = vpow2.f32 %v1204_v3 }
0x1422   :  { %v1527_v2 = vpop.eup %1526 }
0x1423   :  { %989 = vrot.lane.b32.xlu0 %v1527_v2, %s1561_s21 }
0x1424   :  { %v1529_v8 = vpop.eup %1528 }
0x1425   :  { %v983_v4 = vadd.f32 1.0, %v1529_v8 }
0x1427   :  { %1530 = vrcp.f32 %v983_v4 }
0x1431   :  { %v1531_v16 = vpop.eup %1530 }
0x1432   :  { %v987_v15 = vmul.f32 %v1531_v16, %v894_v57 }
0x1495   :  { %v990_v5 = vpop.permute.xlu0 %989 }
0x1496   :  { %v992_v10 = vmul.f32 %v1531_v16, %v990_v5 }
0x1498   :  { %994 = vrot.lane.b32.xlu1 %v992_v10, %s1562_s3 }
0x150a   :  { %v995_v6 = vpop.permute.xlu1 %994 }
0x150b   :  { %v997_v21 = vadd.f32 %v995_v6, %v987_v15 }
0x150d   :  { %1532 = vtanh.f32 %v997_v21 }
0x1517   :  { %v1533_v22 = vpop.eup %1532 }
0x1518   :  { %1000 = vrot.lane.b32.xlu0 %v1533_v22, %s1561_s21 }
0x158a   :  { %v1001_v17 = vpop.permute.xlu0 %1000 }
0x158b   :  { %v1003_v7 = vmul.f32 %v1531_v16, %v1001_v17 }
0x158d   :  { %1005 = vrot.lane.b32.xlu1 %v1003_v7, %s1562_s3 }
0x15ff   :  { %v1006_v9 = vpop.permute.xlu1 %1005 }
0x1600   :  { %1008 = vst.msk [vmem:[#allocation3 + $0x38] sm:$0xff] %vm184_vm2, %v1006_v9 }
0x1607   :  { %v1016_v11 = vld [vmem:[#allocation3 + $0x38] sm:$0xff] }
0x1608   :  { %1398 = vmatmul.mubr.msk.f32.gmra.mrb[16].mxu0 %vm184_vm2, %v1016_v11 }
0x16db   :  { %v1399_v12 = vpop.f32.mrb[16].mxu0 }
0x16dc   :  { %v1154_v13 = vadd.f32 %v1399_v12, %v1787_v36  ;;  %v1148_v14 = vpop.f32.mrb[17].mxu0 }
0x16dd   :  { %v1149_v18 = vadd.f32 %v1787_v36, %v1148_v14 }
0x16de   :  { %1164 = vst [vmem:[#allocation4 + $0x38] sm:$0xff] %v1154_v13 }
0x16df   :  { %1163 = vst [vmem:[#allocation4 + $0x30] sm:$0xff] %v1149_v18 }
0x16e0   :  { %1545 = shalt.err (!%p1542_p4)
}
0x16e1   :  { %s1546_s13 = scalar_lea.hbm %s1831_s6, 1024 }
0x16e2   :  { %p1547_p5 = scmp.ne.s32.totalorder %s1831_s6, %s1546_s13  ;;  %p1550_p6 = scmp.lt.u32.totalorder %s1546_s13, %s1831_s6 }
0x16e4   :  { %p1552_p7 = pnand %p1550_p6, %p1547_p5 }
0x16e6   :  { %1555 = shalt.err (!%p1552_p7)
}
0x16e7   :  { %s1564_s18 = smov 128   ;;  %s1565_s19 = smov 8  }
0x16e8   :  { %1176 = dma.vmem_to_hbm [thread:$0]  %s1171_s9, 1024, %s1831_s6, [#allocation5], %s1564_s18, %s1564_s18, %s1565_s19  }
0x16e9   :  { %1556 = dma.done.wait [#allocation5], 1024  }
0x16ea   :  { %1557 = vsyncadd [#allocation5], 4294966272 }
0x16eb   :  { %1180 = vsyncpa [#allocation5], 1 }

</bundles_post_ra>
